<compile_context>
chip_gen: v5e
topology: v5e:2x2
jax: 0.10.0
libtpu: 0.0.40
codegen_flags: <defaults>
</compile_context>

<pallas_src>
import jax
import jax.numpy as jnp
from jax.experimental import pallas as pl
from jax.experimental.pallas import tpu as pltpu


def _round_up(v, m):
    return ((v + m - 1) // m) * m


def _choose_block_rows(m_rows, row_bytes, weight_bytes, tile_budget, max_rows=2048):
    """Row-tile size: multiple of 8 (or == full M), fits the VMEM tile budget,
    prefers a divisor of m_rows (no padding), and prefers a grid of >= 2."""
    budget_rows = max(8, (tile_budget - weight_bytes) // max(row_bytes, 1))
    cap = min(max_rows, budget_rows)
    cap = max(8, (cap // 8) * 8)

    if m_rows <= cap:
        tm = m_rows if m_rows % 8 == 0 else _round_up(m_rows, 8)
    else:
        # Largest multiple of 8 in [cap//2, cap] dividing m_rows; else pad later.
        tm = cap
        t = cap
        lo = max(8, (cap // 2 // 8) * 8)
        while t >= lo:
            if m_rows % t == 0:
                tm = t
                break
            t -= 8

    # Prefer >= 2 grid steps so the parallel row axis can shard across 2 TCs (v7x).
    if _round_up(m_rows, tm) // tm < 2 and tm >= 16 and (tm // 2) % 8 == 0:
        tm //= 2
    return tm


def _seq_label_kernel(x_ref, w1_ref, b1_ref, wa_ref, ba_ref, out_ref):
    # x_ref : (tm, h)        row tile of flattened input
    # w1_ref: (h, h/2)       self.linear weight, transposed
    # b1_ref: (1, h/2)       f32
    # wa_ref: (h/2, n_pad)   folded + tag-padded linear_a weight, transposed
    # ba_ref: (1, n_pad)     f32 (zero in padded columns)
    x = x_ref[...]
    t = jnp.dot(x, w1_ref[...], preferred_element_type=jnp.float32)
    t = jnp.maximum(t + b1_ref[...], 0.0)                 # bias + ReLU in f32
    t = t.astype(wa_ref.dtype)                            # no-op for the f32 path
    out = jnp.dot(t, wa_ref[...], preferred_element_type=jnp.float32)
    out_ref[...] = (out + ba_ref[...]).astype(out_ref.dtype)


def sequence_label_forward(x, w_lin, b_lin, w_a, b_a, *, compute_dtype=jnp.float32):
    """x: (bs, seq, h). Returns (sub_output, obj_output), each (bs, seq, tag)."""
    bs, seq, h = x.shape
    assert h % 2 == 0
    half = h // 2
    tag = w_a.shape[0]
    M = bs * seq

    compute_dtype = jnp.dtype(compute_dtype)
    in_bytes = compute_dtype.itemsize
    n_pad = max(128, _round_up(tag, 128))        # lane-dense output / full MXU width

    # Fold linear_a: cat([t, t], -1) @ W_a^T == t @ (W_a[:, :half] + W_a[:, half:]).T
    wa_folded = (w_a[:, :half] + w_a[:, half:]).T.astype(compute_dtype)   # (half, tag)
    wa_p = jnp.zeros((half, n_pad), compute_dtype).at[:, :tag].set(wa_folded)
    ba_p = jnp.zeros((1, n_pad), jnp.float32).at[0, :tag].set(b_a.astype(jnp.float32))

    w1_t = w_lin.T.astype(compute_dtype)                                  # (h, half)
    b1 = b_lin.reshape(1, half).astype(jnp.float32)
    x2d = x.reshape(M, h).astype(compute_dtype)

    # Row-tile sizing against a conservative VMEM budget (valid on v5e/v6e/v7x).
    weight_bytes = 2 * (h * half * in_bytes + half * n_pad * in_bytes
                        + half * 4 + n_pad * 4)
    row_bytes = 2 * (h * in_bytes + n_pad * 4)           # double-buffered in + out
    tm = _choose_block_rows(M, row_bytes, weight_bytes, tile_budget=24 * 1024 * 1024)

    m_pad = _round_up(M, tm)
    if m_pad != M:   # rare fallback when no good divisor of M exists
        x2d = jnp.pad(x2d, ((0, m_pad - M), (0, 0)))

    out = pl.pallas_call(
        _seq_label_kernel,
        out_shape=jax.ShapeDtypeStruct((m_pad, n_pad), jnp.float32),
        grid_spec=pltpu.PrefetchScalarGridSpec(
            num_scalar_prefetch=0,
            grid=(m_pad // tm,),
            in_specs=[
                pl.BlockSpec((tm, h), lambda i: (i, 0)),
                pl.BlockSpec((h, half), lambda i: (0, 0)),     # resident weights
                pl.BlockSpec((1, half), lambda i: (0, 0)),
                pl.BlockSpec((half, n_pad), lambda i: (0, 0)),
                pl.BlockSpec((1, n_pad), lambda i: (0, 0)),
            ],
            out_specs=pl.BlockSpec((tm, n_pad), lambda i: (i, 0)),
        ),
        compiler_params=pltpu.CompilerParams(
            dimension_semantics=("parallel",),
            vmem_limit_bytes=32 * 1024 * 1024,
        ),
    )(x2d, w1_t, b1, wa_p, ba_p)

    sub = out[:M, :tag].reshape(bs, seq, tag)
    # linear_a is applied to both (identical) branches -> obj == sub exactly.
    return sub, sub


def _init_params(key, hidden_size, tag_size):
    """Deterministic init mimicking nn.Linear's uniform(-1/sqrt(fan_in), ...)."""
    half = hidden_size // 2
    k1, k2, k3, k4 = jax.random.split(key, 4)
    bnd_lin = 1.0 / jnp.sqrt(hidden_size)
    w_lin = jax.random.uniform(k1, (half, hidden_size), jnp.float32, -bnd_lin, bnd_lin)
    b_lin = jax.random.uniform(k2, (half,), jnp.float32, -bnd_lin, bnd_lin)
    bnd_a = 1.0 / jnp.sqrt(hidden_size)   # linear_a fan_in = hidden_size (post-concat)
    w_a = jax.random.uniform(k3, (tag_size, hidden_size), jnp.float32, -bnd_a, bnd_a)
    b_a = jax.random.uniform(k4, (tag_size,), jnp.float32, -bnd_a, bnd_a)
    return w_lin, b_lin, w_a, b_a


if __name__ == "__main__":
    bs, seq, hidden, tag = 2, 8, 32, 4

    key = jax.random.PRNGKey(0)
    kx, kp = jax.random.split(key)
    x = jax.random.normal(kx, (bs, seq, hidden), jnp.float32)
    w_lin, b_lin, w_a, b_a = _init_params(kp, hidden, tag)

    sub_out, obj_out = sequence_label_forward(x, w_lin, b_lin, w_a, b_a)
    jax.block_until_ready((sub_out, obj_out))

    # Plain-JAX reference of the eval-mode forward (unfolded, as in the module),
    # computed at highest matmul precision.
    hp = jax.lax.Precision.HIGHEST
    t = jnp.maximum(jnp.einsum("bsh,oh->bso", x, w_lin, precision=hp) + b_lin, 0.0)
    f = jnp.concatenate([t, t], axis=-1)
    ref = jnp.einsum("bsh,oh->bso", f, w_a, precision=hp) + b_a

    # Tolerance covers FP reordering from the weight fold and possible MXU
    # multi-pass precision differences for f32 operands.
    assert sub_out.shape == ref.shape and obj_out.shape == ref.shape
    assert jnp.allclose(sub_out, ref, atol=2e-2, rtol=2e-2)
    assert jnp.allclose(obj_out, ref, atol=2e-2, rtol=2e-2)

    # Optional bf16-input MXU path (f32 accumulation): looser tolerance.
    sub_bf16, _ = sequence_label_forward(x, w_lin, b_lin, w_a, b_a,
                                         compute_dtype=jnp.bfloat16)
    jax.block_until_ready(sub_bf16)
    assert jnp.allclose(sub_bf16, ref, atol=6e-2, rtol=6e-2)

    print("KERNEL_OK")
</pallas_src>

<mosaic_0001>
module attributes {stable_mosaic.version = 11 : i64} {
  func.func @_seq_label_kernel(%arg0: i32, %arg1: memref<8x32xf32, #tpu.memory_space<vmem>>, %arg2: memref<32x16xf32, #tpu.memory_space<vmem>>, %arg3: memref<1x16xf32, #tpu.memory_space<vmem>>, %arg4: memref<16x128xf32, #tpu.memory_space<vmem>>, %arg5: memref<1x128xf32, #tpu.memory_space<vmem>>, %arg6: memref<8x128xf32, #tpu.memory_space<vmem>>) attributes {dimension_semantics = [#tpu.dimension_semantics<parallel>], iteration_bounds = array<i64: 2>, scalar_prefetch = 0 : i64, scratch_operands = 0 : i64, tpu.core_type = #tpu.core_type<tc>, window_params = [{transform_indices = @transform_0, window_bounds = array<i64: 8, 32>}, {pipeline_mode = #tpu.pipeline_mode<synchronous>, transform_indices = @transform_1, window_bounds = array<i64: 32, 16>}, {pipeline_mode = #tpu.pipeline_mode<synchronous>, transform_indices = @transform_2, window_bounds = array<i64: 1, 16>}, {pipeline_mode = #tpu.pipeline_mode<synchronous>, transform_indices = @transform_3, window_bounds = array<i64: 16, 128>}, {pipeline_mode = #tpu.pipeline_mode<synchronous>, transform_indices = @transform_4, window_bounds = array<i64: 1, 128>}, {transform_indices = @transform_5, window_bounds = array<i64: 8, 128>}]} {
    %c0 = arith.constant 0 : index
    %c0_0 = arith.constant 0 : index
    %0 = vector.load %arg1[%c0, %c0_0] : memref<8x32xf32, #tpu.memory_space<vmem>>, vector<8x32xf32>
    %c0_1 = arith.constant 0 : index
    %c0_2 = arith.constant 0 : index
    %1 = vector.load %arg2[%c0_1, %c0_2] : memref<32x16xf32, #tpu.memory_space<vmem>>, vector<32x16xf32>
    %cst = arith.constant dense<0.000000e+00> : vector<8x16xf32>
    %2 = tpu.matmul %0, %1, %cst {dimension_numbers = #tpu.dot_dimension_numbers<[1], [0], [0], [1], [0, 0, 1, 1], [], []>} : vector<8x32xf32>, vector<32x16xf32>, vector<8x16xf32> -> vector<8x16xf32>
    %c0_3 = arith.constant 0 : index
    %c0_4 = arith.constant 0 : index
    %3 = vector.load %arg3[%c0_3, %c0_4] : memref<1x16xf32, #tpu.memory_space<vmem>>, vector<1x16xf32>
    %4 = vector.broadcast %3 : vector<1x16xf32> to vector<8x16xf32>
    %5 = arith.addf %2, %4 : vector<8x16xf32>
    %cst_5 = arith.constant 0.000000e+00 : f32
    %6 = vector.broadcast %cst_5 : f32 to vector<8x16xf32>
    %7 = arith.maximumf %5, %6 : vector<8x16xf32>
    %c0_6 = arith.constant 0 : index
    %c0_7 = arith.constant 0 : index
    %8 = vector.load %arg4[%c0_6, %c0_7] : memref<16x128xf32, #tpu.memory_space<vmem>>, vector<16x128xf32>
    %cst_8 = arith.constant dense<0.000000e+00> : vector<8x128xf32>
    %9 = tpu.matmul %7, %8, %cst_8 {dimension_numbers = #tpu.dot_dimension_numbers<[1], [0], [0], [1], [0, 0, 1, 1], [], []>} : vector<8x16xf32>, vector<16x128xf32>, vector<8x128xf32> -> vector<8x128xf32>
    %c0_9 = arith.constant 0 : index
    %c0_10 = arith.constant 0 : index
    %10 = vector.load %arg5[%c0_9, %c0_10] : memref<1x128xf32, #tpu.memory_space<vmem>>, vector<1x128xf32>
    %11 = vector.broadcast %10 : vector<1x128xf32> to vector<8x128xf32>
    %12 = arith.addf %9, %11 : vector<8x128xf32>
    %c0_11 = arith.constant 0 : index
    %c0_12 = arith.constant 0 : index
    %13 = vector.load %arg6[%c0_11, %c0_12] : memref<8x128xf32, #tpu.memory_space<vmem>>, vector<8x128xf32>
    tpu.vector_store %arg6[%c0_11, %c0_12], %12 {strides = array<i32>} : memref<8x128xf32, #tpu.memory_space<vmem>>, vector<8x128xf32>,
    return
  }
  func.func @transform_0(%arg0: i32) -> (i32, i32) {
    %c0_i32 = arith.constant 0 : i32
    %c0_i32_0 = arith.constant 0 : i32
    return %arg0, %c0_i32 : i32, i32
  }
  func.func @transform_1(%arg0: i32) -> (i32, i32) {
    %c0_i32 = arith.constant 0 : i32
    %c0_i32_0 = arith.constant 0 : i32
    %c0_i32_1 = arith.constant 0 : i32
    return %c0_i32, %c0_i32_0 : i32, i32
  }
  func.func @transform_2(%arg0: i32) -> (i32, i32) {
    %c0_i32 = arith.constant 0 : i32
    %c0_i32_0 = arith.constant 0 : i32
    %c0_i32_1 = arith.constant 0 : i32
    return %c0_i32, %c0_i32_0 : i32, i32
  }
  func.func @transform_3(%arg0: i32) -> (i32, i32) {
    %c0_i32 = arith.constant 0 : i32
    %c0_i32_0 = arith.constant 0 : i32
    %c0_i32_1 = arith.constant 0 : i32
    return %c0_i32, %c0_i32_0 : i32, i32
  }
  func.func @transform_4(%arg0: i32) -> (i32, i32) {
    %c0_i32 = arith.constant 0 : i32
    %c0_i32_0 = arith.constant 0 : i32
    %c0_i32_1 = arith.constant 0 : i32
    return %c0_i32, %c0_i32_0 : i32, i32
  }
  func.func @transform_5(%arg0: i32) -> (i32, i32) {
    %c0_i32 = arith.constant 0 : i32
    %c0_i32_0 = arith.constant 0 : i32
    return %arg0, %c0_i32 : i32, i32
  }
}

</mosaic_0001>

<bundles_post_ra>
// kernel: tpu_custom_call.1
= control target key start
LH: loop header
LB: loop body
LE: loop exit
PB: predicated region body
PF: predicated region fallthrough
CT: control target
= control target key end

     0   :  { %10 = vsyncpa [#allocation3], 0  ;;  %s616_s0 = inlined_call_operand.vmem [shape: f32[16,32], index: 0, kind: input, shape index: {}]   ;;  %s617_s1 = inlined_call_operand.vmem [shape: f32[32,16], index: 1, kind: input, shape index: {}]   ;;  %s618_s2 = inlined_call_operand.vmem [shape: f32[1,16], index: 2, kind: input, shape index: {}]   ;;  %s619_s3 = inlined_call_operand.vmem [shape: f32[16,128], index: 3, kind: input, shape index: {}]   ;;  %s620_s4 = inlined_call_operand.vmem [shape: f32[1,128], index: 4, kind: input, shape index: {}]   ;;  %s621_s5 = inlined_call_operand.hbm [shape: f32[16,128], index: 5, kind: output, shape index: {}]  }
   0x1   :  { %12 = vsyncpa [#allocation3 + $0x1], 0  ;;  %s507_s18 = smov 0   ;;  %s509_s19 = smov 0  }
   0x2   :  { %s511_s20 = smov 0   ;;  %s513_s21 = smov 0  }
   0x3 LB: > { %s528_s22 = sadd.s32 4294967295, %s475_s21   ;;  %s360_s23 = sadd.s32 4294967294, %s475_s21   ;;  %s475_s21 = sphi %s513_s21, %s627_s21   ;;  %s471_s20 = sphi %s511_s20, %s626_s20   ;;  %s467_s19 = sphi %s509_s19, %s625_s19   ;;  %s463_s18 = sphi %s507_s18, %s624_s18  }
   0x4   : > { %s532_s24 = sadd.s32 1, %s475_s21   ;;  %s135_s25 = sadd.s32 1, %s471_s20 }
   0x5   : > { %s132_s26 = ssub.s32 %s475_s21, %s532_s24  ;;  %p145_p0 = scmp.ne.s32.totalorder %s471_s20, %s467_s19 }
   0x6   : > { %p133_p1 = scmp.eq.s32.totalorder %s132_s26, 0  ;;  %p146_p2 = scmp.eq.s32.totalorder %s528_s22, 1 }
   0x7   : > { %p151_p3 = scmp.ne.s32.totalorder %s467_s19, %s463_s18  ;;  %p152_p4 = scmp.eq.s32.totalorder %s360_s23, 1 }
   0x8   : > { %s543_s27 = scalar_select %p133_p1, %s471_s20, %s135_s25  }
   0x9   : > { %p545_p5 = por %p146_p2, %p145_p0  ;;  %p549_p6 = por %p152_p4, %p151_p3 }
   0xa   : > { %p363_p7 = scmp.ge.s32.totalorder %s475_s21, 1  ;;  %p189_p8 = scmp.lt.s32.totalorder %s475_s21, 3 }
   0xc   : > { %p190_p9 = pnand %p363_p7, %p189_p8 }
   0xd   : > { %p216_p10 = scmp.lt.s32.totalorder (!%p190_p9), %s528_s22, 1  ;;  %s213_s8 = sand.u32 (!%p190_p9), 1, %s467_s19  }
   0xe   : > { %193 = sbr.rel (%p190_p9) target bundleno = 288 (0x120), region = 40  ;;  %s364_s9 = sshll.u32 (!%p190_p9), %s213_s8, 3 }
   0xf   : > { %s369_s10 = sshll.u32 (!%p190_p9), %s528_s22, 3  ;;  %s215_s16 = scalar_lea.vmem (!%p190_p9), [#allocation2], %s364_s9 }
  0x10   : > { %s296_s13 = scalar_lea.hbm (!%p190_p9), %s621_s5, %s369_s10  ;;  %s286_s25 = scalar_lea.sflag (!%p190_p9), [#allocation3], %s213_s8 }
  0x11   : > { %s300_s23 = sshll.u32 (!%p190_p9), %s296_s13, 4  ;;  %s433_s7 = scalar_lea.hbm (!%p190_p9), %s621_s5, 16  ;;  %s301_s23 = int_to_ptr.hbm [resolvable:$true] %s300_s23 }
  0x12   : > { %s427_s26 = sshra.s32 (!%p190_p9), %s301_s23, 4  ;;  %s428_s26 = int_to_ptr.hbm [resolvable:$true] %s427_s26 }
  0x13   : > { %v224_v0 = vld [vmem:[%s617_s1 + $0x18] sm:$0xff]  ;;  %v223_v1 = vld [vmem:[%s617_s1 + $0x10] sm:$0xff]  ;;  %v222_v2 = vld [vmem:[%s617_s1 + $0x8] sm:$0xff]  ;;  %s217_s11 = scalar_select %p216_p10, %s528_s22, 1  ;;  %vm229_vm0 = vcmask 261120   ;;  %vm260_vm1 = vcmask 130048  }
  0x14   : > { %245 = vmatpush.msra.mxu0 %v224_v0  ;;  %v221_v3 = vld [vmem:[%s617_s1] sm:$0xff]  ;;  %v255_v5 = vld [vmem:[%s619_s3 + $0x8] sm:$0xff]  ;;  %s429_s22 = scalar_lea.hbm %s428_s26, 8  ;;  %p434_p0 = scmp.lt.s32.totalorder %s428_s26, %s621_s5 }
  0x15   : > { %s365_s14 = sshll.u32 %s217_s11, 3  ;;  %278 = vmatpush.msra.mxu1 %v255_v5  ;;  %v254_v6 = vld [vmem:[%s619_s3] sm:$0xff]  ;;  %p430_p11 = scmp.ne.s32.totalorder %s428_s26, %s429_s22 }
  0x16   : > { %246 = vmatpush.msra.mxu0 %v223_v1  ;;  %s219_s17 = scalar_lea.vmem %s616_s0, %s365_s14  ;;  %v411_v7 = vld [vmem:[%s618_s2] ss:$0 sm:$0xff]  ;;  %p435_p1 = scmp.lt.s32.totalorder %s433_s7, %s429_s22 }
  0x17   : > { %v220_v4 = vld [vmem:[%s219_s17] sm:$0xff]  ;;  %279 = vmatpush.msra.mxu1 %v254_v6  ;;  %s298_s17 = sshll.u32 %s215_s16, 4  ;;  %p431_p12 = pnand %p430_p11, %p545_p5  ;;  %s299_s17 = int_to_ptr.vmem [resolvable:$true] %s298_s17 }
  0x18   : > { %247 = vmatpush.msra.mxu0 %v222_v2  ;;  %v412_v11 = vld [vmem:[%s620_s4] ss:$0 sm:$0xff]  ;;  %p436_p2 = por %p435_p1, %p434_p0 }
  0x19   : > { %p432_p13 = pneg %p431_p12 }
  0x1a   : > { %248 = vmatpush.msra.mxu0 %v221_v3 }
  0x1b   : > { %366 = vmatmul.msk.f32.vlgmr.msra.gmra.mxu0 %vm229_vm0, %v220_v4  ;;  %p437_p3 = pnand %p436_p2, %p432_p13 }
  0x98   : > { %v250_v8 = vpop.f32.mrf.mxu0 }
  0x99   : > { %v251_v9 = vadd.f32 %v411_v7, %v250_v8 }
  0x9b   : > { %v253_v10 = vmax.f32 %v251_v9, 0.0 }
  0x9d   : > { %367 = vmatmul.msk.f32.vlgmr.msra.gmra.mxu1 %vm260_vm1, %v253_v10 }
 0x11a   : > { %v281_v12 = vpop.f32.mrf.mxu1 }
 0x11b   : > { %v282_v13 = vadd.f32 %v412_v11, %v281_v12 }
 0x11d   : > { %284 = vst [vmem:[%s215_s16] sm:$0xff] %v282_v13 }
 0x11e   : > { %440 = shalt.err (!%p437_p3)
}
 0x11f   : > { %372 = dma.vmem_to_hbm [thread:$0]  (%p545_p5), %s299_s17, 128, %s301_s23, %s286_s25  }
 0x120 PF: > { %p378_p4 = scmp.ge.s32.totalorder %s475_s21, 2  ;;  %s312_s8 = sand.u32 1, %s463_s18  }
 0x121   : > { %s313_s11 = scalar_lea.sflag [#allocation3], %s312_s8 }
 0x122   : > { %p375_p7 = pnand %p378_p4, %p549_p6 }
 0x124   : > { %p376_p8 = pneg %p375_p7 }
 0x126   : > { %458 = dma.done.wait (%p376_p8), %s313_s11, 128  }
 0x127   : > { %460 = vsyncadd (%p376_p8), %s313_s11, 4294967168  ;;  %p15_p9 = scmp.ge.s32.totalorder %s532_s24, 4   ;;  %s624_s18 = smov %s467_s19 }
 0x128   : > { %s625_s19 = smov %s471_s20  ;;  %s626_s20 = smov %s543_s27 }
 0x129   : > { %s627_s21 = smov %s532_s24  ;;  %17 = sbr.rel (!%p15_p9) target bundleno = 3 (0x3), region = 75 }
 0x12e   :  { %319 = vsyncpa [#allocation3], 1 }
 0x12f   :  { %321 = vsyncpa [#allocation3 + $0x1], 1 }

</bundles_post_ra>
